<compile_context>
chip_gen: v5e
topology: v5e:2x2
jax: 0.10.0
libtpu: 0.0.40
codegen_flags: <defaults>
</compile_context>

<pallas_src>
import functools

import jax
import jax.numpy as jnp
from jax.experimental import pallas as pl
from jax.experimental.pallas import tpu as pltpu


def _round_up(x, m):
    return ((x + m - 1) // m) * m


# ----------------------------------------------------------------------------
# Pallas kernels (all refs whole-block VMEM; weights come as packed slabs)
# ----------------------------------------------------------------------------
def _mlp_kernel(x_ref, w_ref, b_ref, o_ref, *, n_hidden):
    """hidden stack (Linear -> ReLU)*n_hidden, then output Linear. Lane-dense out."""
    h = x_ref[...]
    for l in range(n_hidden):
        h = jnp.maximum(
            jnp.dot(h, w_ref[l], preferred_element_type=jnp.float32) + b_ref[l], 0.0
        )
    o_ref[...] = (
        jnp.dot(h, w_ref[n_hidden], preferred_element_type=jnp.float32)
        + b_ref[n_hidden]
    )


def _dueling_kernel(x_ref, w_ref, b_ref, o_ref, *, n_hidden, output_size, inv_count):
    """Hidden stack, then FUSED dueling head (2 matmuls instead of 4).

    Slab layout (built in DQNPallas._pack):
      layer n_hidden   : cols [0:12] = value-stream fc1, cols [12:24] = advantage fc1
      layer n_hidden+1 : block-diagonal; advantage -> lanes [0:out], value -> lane [out]
    """
    h = x_ref[...]
    for l in range(n_hidden):
        h = jnp.maximum(
            jnp.dot(h, w_ref[l], preferred_element_type=jnp.float32) + b_ref[l], 0.0
        )
    h1 = jnp.maximum(
        jnp.dot(h, w_ref[n_hidden], preferred_element_type=jnp.float32)
        + b_ref[n_hidden],
        0.0,
    )
    va = (
        jnp.dot(h1, w_ref[n_hidden + 1], preferred_element_type=jnp.float32)
        + b_ref[n_hidden + 1]
    )
    v = va[:, output_size : output_size + 1]                      # (B, 1) value
    # torch semantics: advantage.mean() over ALL elements (batch AND action dims)
    mean_a = jnp.sum(va[:, :output_size]) * inv_count
    # lanes >= output_size carry junk; wrapper slices them away
    o_ref[...] = va + v - mean_a


# ----------------------------------------------------------------------------
# jitted forward wrapper
# ----------------------------------------------------------------------------
@functools.partial(jax.jit, static_argnames=("n_hidden", "output_size", "dueling"))
def _dqn_forward(x, w_slab, b_slab, *, n_hidden, output_size, dueling):
    B, in_f = x.shape
    L, F_pad, _ = w_slab.shape

    if dueling:
        # global advantage mean couples all batch rows -> single block over batch
        # (block shape equals the full array dims, so (8,128) divisibility is waived)
        tile_b, b_pad = B, B
        kernel = functools.partial(
            _dueling_kernel,
            n_hidden=n_hidden,
            output_size=output_size,
            inv_count=1.0 / float(B * output_size),
        )
        dim_sem = ("arbitrary",)
    else:
        b8 = _round_up(B, 8)
        tile_b = 128 if b8 >= 128 else b8
        b_pad = _round_up(B, tile_b)
        kernel = functools.partial(_mlp_kernel, n_hidden=n_hidden)
        dim_sem = ("parallel",)  # v7x: shard batch tiles across the two TensorCores

    # zero-pad input to lane-dense (padded feature lanes stay exactly 0 through
    # the net because padded weight rows/cols and bias lanes are 0)
    x_p = jnp.zeros((b_pad, F_pad), jnp.float32).at[:B, :in_f].set(
        x.astype(jnp.float32)
    )

    grid = (b_pad // tile_b,)
    flops = 2 * b_pad * F_pad * F_pad * L
    bytes_accessed = 4 * (2 * b_pad * F_pad + L * F_pad * F_pad + L * F_pad)

    out = pl.pallas_call(
        kernel,
        out_shape=jax.ShapeDtypeStruct((b_pad, F_pad), jnp.float32),
        grid_spec=pltpu.PrefetchScalarGridSpec(
            num_scalar_prefetch=0,
            grid=grid,
            in_specs=[
                pl.BlockSpec((tile_b, F_pad), lambda i: (i, 0)),
                pl.BlockSpec((L, F_pad, F_pad), lambda i: (0, 0, 0)),  # resident slab
                pl.BlockSpec((L, 1, F_pad), lambda i: (0, 0, 0)),      # resident slab
            ],
            out_specs=pl.BlockSpec((tile_b, F_pad), lambda i: (i, 0)),
        ),
        compiler_params=pltpu.CompilerParams(dimension_semantics=dim_sem),
        cost_estimate=pl.CostEstimate(
            flops=flops, transcendentals=0, bytes_accessed=bytes_accessed
        ),
    )(x_p, w_slab, b_slab)

    return out[:B, :output_size]


# ----------------------------------------------------------------------------
# Parameter construction (deterministic, mirrors PyTorch init shapes/rules)
# ----------------------------------------------------------------------------
def _init_linear(key, in_f, out_f):
    kw, kb = jax.random.split(key)
    bound = 1.0 / jnp.sqrt(jnp.float32(in_f))
    w = jax.random.uniform(kw, (out_f, in_f), jnp.float32, -bound, bound)
    b = jax.random.uniform(kb, (out_f,), jnp.float32, -bound, bound)
    return {"w": w, "b": b}


def _init_noisy_linear(key, in_f, out_f, std_init=0.4):
    kmu_w, kmu_b, keps_w, keps_b = jax.random.split(key, 4)
    mu_range = 1.0 / jnp.sqrt(jnp.float32(in_f))
    return {
        "weight_mu": jax.random.uniform(
            kmu_w, (out_f, in_f), jnp.float32, -mu_range, mu_range
        ),
        "weight_sigma": jnp.full(
            (out_f, in_f), std_init / jnp.sqrt(jnp.float32(in_f)), jnp.float32
        ),
        "weight_epsilon": jax.random.normal(keps_w, (out_f, in_f), jnp.float32),
        "bias_mu": jax.random.uniform(
            kmu_b, (out_f,), jnp.float32, -mu_range, mu_range
        ),
        "bias_sigma": jnp.full(
            (out_f,), std_init / jnp.sqrt(jnp.float32(out_f)), jnp.float32
        ),
        "bias_epsilon": jax.random.normal(keps_b, (out_f,), jnp.float32),
    }


def _noisy_effective(p, training):
    if training:
        w = p["weight_mu"] + p["weight_sigma"] * p["weight_epsilon"]
        b = p["bias_mu"] + p["bias_sigma"] * p["bias_epsilon"]
    else:
        w, b = p["weight_mu"], p["bias_mu"]
    return {"w": w, "b": b}


class DQNPallas:
    """JAX/Pallas port of the PyTorch DQN module (fused single-kernel forward)."""

    def __init__(self, input_size, output_size, hidden_size_list,
                 dueling=False, is_noisy=False, training=True, seed=0):
        self.input_size = input_size
        self.output_size = output_size
        self.hidden_size_list = list(hidden_size_list)
        self.dueling = dueling
        self.is_noisy = is_noisy
        self.training = training

        key = jax.random.PRNGKey(seed)
        self._noise_key = jax.random.PRNGKey(seed + 1)
        keys = iter(jax.random.split(key, 4 + 2 * len(self.hidden_size_list) + 8))

        # hidden stack
        self.hidden = []
        prev = input_size
        for h in self.hidden_size_list:
            self.hidden.append(_init_linear(next(keys), prev, h))
            prev = h

        if not dueling:
            if is_noisy:
                self.out_noisy = _init_noisy_linear(next(keys), prev, output_size)
            else:
                self.out_lin = _init_linear(next(keys), prev, output_size)
        else:
            self.v1 = _init_linear(next(keys), prev, 12)
            self.v2 = _init_linear(next(keys), 12, 1)
            self.a1 = _init_linear(next(keys), prev, 12)
            if is_noisy:
                self.a2_noisy = _init_noisy_linear(next(keys), 12, output_size)
            else:
                self.a2 = _init_linear(next(keys), 12, output_size)

        self._pack()

    # --- pack (pre-transposed, zero-padded) parameter slabs once -------------
    def _pack(self):
        dims = [self.input_size] + self.hidden_size_list + [self.output_size]
        if self.dueling:
            dims += [24, self.output_size + 1]
        F_pad = _round_up(max(dims), 128)
        n_hidden = len(self.hidden_size_list)
        L = n_hidden + (2 if self.dueling else 1)

        w_slab = jnp.zeros((L, F_pad, F_pad), jnp.float32)
        b_slab = jnp.zeros((L, 1, F_pad), jnp.float32)

        for l, p in enumerate(self.hidden):
            o, i = p["w"].shape
            w_slab = w_slab.at[l, :i, :o].set(p["w"].T)
            b_slab = b_slab.at[l, 0, :o].set(p["b"])

        if not self.dueling:
            head = (
                _noisy_effective(self.out_noisy, self.training)
                if self.is_noisy else self.out_lin
            )
            o, i = head["w"].shape
            w_slab = w_slab.at[n_hidden, :i, :o].set(head["w"].T)
            b_slab = b_slab.at[n_hidden, 0, :o].set(head["b"])
        else:
            prev = self.hidden_size_list[-1]
            out = self.output_size
            a2 = (
                _noisy_effective(self.a2_noisy, self.training)
                if self.is_noisy else self.a2
            )
            # fused stage 1: lanes [0:12] value stream, [12:24] advantage stream
            l1 = n_hidden
            w_slab = w_slab.at[l1, :prev, 0:12].set(self.v1["w"].T)
            w_slab = w_slab.at[l1, :prev, 12:24].set(self.a1["w"].T)
            b_slab = b_slab.at[l1, 0, 0:12].set(self.v1["b"])
            b_slab = b_slab.at[l1, 0, 12:24].set(self.a1["b"])
            # fused stage 2 (block-diagonal, off-diagonal blocks exactly zero):
            #   advantage -> lanes [0:out], value -> lane [out]
            l2 = n_hidden + 1
            w_slab = w_slab.at[l2, 0:12, out:out + 1].set(self.v2["w"].T)
            w_slab = w_slab.at[l2, 12:24, 0:out].set(a2["w"].T)
            b_slab = b_slab.at[l2, 0, 0:out].set(a2["b"])
            b_slab = b_slab.at[l2, 0, out].set(self.v2["b"][0])

        self.w_slab = w_slab
        self.b_slab = b_slab

    def reset_noise(self):
        if not self.is_noisy:
            return
        self._noise_key, k1, k2 = jax.random.split(self._noise_key, 3)
        p = self.a2_noisy if self.dueling else self.out_noisy
        p["weight_epsilon"] = jax.random.normal(k1, p["weight_epsilon"].shape, jnp.float32)
        p["bias_epsilon"] = jax.random.normal(k2, p["bias_epsilon"].shape, jnp.float32)
        self._pack()

    def __call__(self, x):
        return _dqn_forward(
            x, self.w_slab, self.b_slab,
            n_hidden=len(self.hidden_size_list),
            output_size=self.output_size,
            dueling=self.dueling,
        )

    # pure-JAX reference (uses the raw, unpacked parameters -> also validates packing)
    def reference(self, x):
        h = x.astype(jnp.float32)
        for p in self.hidden:
            h = jnp.maximum(h @ p["w"].T + p["b"], 0.0)
        if not self.dueling:
            head = (
                _noisy_effective(self.out_noisy, self.training)
                if self.is_noisy else self.out_lin
            )
            return h @ head["w"].T + head["b"]
        v = jnp.maximum(h @ self.v1["w"].T + self.v1["b"], 0.0) @ self.v2["w"].T + self.v2["b"]
        a2 = (
            _noisy_effective(self.a2_noisy, self.training)
            if self.is_noisy else self.a2
        )
        a = jnp.maximum(h @ self.a1["w"].T + self.a1["b"], 0.0) @ a2["w"].T + a2["b"]
        return v + a - jnp.mean(a)   # torch: advantage.mean() over ALL elements


# ----------------------------------------------------------------------------
if __name__ == "__main__":
    B, INPUT, OUTPUT = 8, 16, 4
    HIDDEN = [32, 32]

    key = jax.random.PRNGKey(0)
    x = jax.random.normal(key, (B, INPUT), jnp.float32)

    # config 1: plain MLP head (module defaults: dueling=False, is_noisy=False)
    model = DQNPallas(INPUT, OUTPUT, HIDDEN, dueling=False, is_noisy=False, seed=0)
    out = jax.block_until_ready(model(x))
    assert out.shape == (B, OUTPUT)
    assert jnp.allclose(out, model.reference(x), atol=1e-4, rtol=1e-4)

    # config 2: dueling + noisy head (training-mode effective weights)
    model_d = DQNPallas(INPUT, OUTPUT, HIDDEN, dueling=True, is_noisy=True,
                        training=True, seed=1)
    out_d = jax.block_until_ready(model_d(x))
    assert out_d.shape == (B, OUTPUT)
    assert jnp.allclose(out_d, model_d.reference(x), atol=1e-4, rtol=1e-4)

    # exercise reset_noise -> repack -> rerun (noisy head re-sampled)
    model_d.reset_noise()
    out_d2 = jax.block_until_ready(model_d(x))
    assert jnp.allclose(out_d2, model_d.reference(x), atol=1e-4, rtol=1e-4)

    print("KERNEL_OK")
</pallas_src>

<mosaic_0001>
module attributes {stable_mosaic.version = 11 : i64} {
  func.func @_mlp_kernel(%arg0: i32, %arg1: memref<8x128xf32, #tpu.memory_space<vmem>>, %arg2: memref<3x128x128xf32, #tpu.memory_space<vmem>>, %arg3: memref<3x1x128xf32, #tpu.memory_space<vmem>>, %arg4: memref<8x128xf32, #tpu.memory_space<vmem>>) attributes {dimension_semantics = [#tpu.dimension_semantics<parallel>], iteration_bounds = array<i64: 1>, scalar_prefetch = 0 : i64, scratch_operands = 0 : i64, tpu.core_type = #tpu.core_type<tc>, window_params = [{transform_indices = @transform_0, window_bounds = array<i64: 8, 128>}, {pipeline_mode = #tpu.pipeline_mode<synchronous>, transform_indices = @transform_1, window_bounds = array<i64: 3, 128, 128>}, {pipeline_mode = #tpu.pipeline_mode<synchronous>, transform_indices = @transform_2, window_bounds = array<i64: 3, 1, 128>}, {transform_indices = @transform_3, window_bounds = array<i64: 8, 128>}]} {
    %c0 = arith.constant 0 : index
    %c0_0 = arith.constant 0 : index
    %0 = vector.load %arg1[%c0, %c0_0] : memref<8x128xf32, #tpu.memory_space<vmem>>, vector<8x128xf32>
    %c0_1 = arith.constant 0 : index
    %c0_2 = arith.constant 0 : index
    %c0_3 = arith.constant 0 : index
    %1 = vector.load %arg2[%c0_1, %c0_2, %c0_3] : memref<3x128x128xf32, #tpu.memory_space<vmem>>, vector<1x128x128xf32>
    %2 = vector.shape_cast %1 : vector<1x128x128xf32> to vector<128x128xf32>
    %cst = arith.constant dense<0.000000e+00> : vector<8x128xf32>
    %3 = tpu.matmul %0, %2, %cst {dimension_numbers = #tpu.dot_dimension_numbers<[1], [0], [0], [1], [0, 0, 1, 1], [], []>} : vector<8x128xf32>, vector<128x128xf32>, vector<8x128xf32> -> vector<8x128xf32>
    %c0_4 = arith.constant 0 : index
    %c0_5 = arith.constant 0 : index
    %c0_6 = arith.constant 0 : index
    %4 = vector.load %arg3[%c0_4, %c0_5, %c0_6] : memref<3x1x128xf32, #tpu.memory_space<vmem>>, vector<1x1x128xf32>
    %5 = vector.shape_cast %4 : vector<1x1x128xf32> to vector<1x128xf32>
    %6 = vector.broadcast %5 : vector<1x128xf32> to vector<8x128xf32>
    %7 = arith.addf %3, %6 : vector<8x128xf32>
    %cst_7 = arith.constant 0.000000e+00 : f32
    %8 = vector.broadcast %cst_7 : f32 to vector<8x128xf32>
    %9 = arith.maximumf %7, %8 : vector<8x128xf32>
    %c1 = arith.constant 1 : index
    %c0_8 = arith.constant 0 : index
    %c0_9 = arith.constant 0 : index
    %10 = vector.load %arg2[%c1, %c0_8, %c0_9] : memref<3x128x128xf32, #tpu.memory_space<vmem>>, vector<1x128x128xf32>
    %11 = vector.shape_cast %10 : vector<1x128x128xf32> to vector<128x128xf32>
    %cst_10 = arith.constant dense<0.000000e+00> : vector<8x128xf32>
    %12 = tpu.matmul %9, %11, %cst_10 {dimension_numbers = #tpu.dot_dimension_numbers<[1], [0], [0], [1], [0, 0, 1, 1], [], []>} : vector<8x128xf32>, vector<128x128xf32>, vector<8x128xf32> -> vector<8x128xf32>
    %c1_11 = arith.constant 1 : index
    %c0_12 = arith.constant 0 : index
    %c0_13 = arith.constant 0 : index
    %13 = vector.load %arg3[%c1_11, %c0_12, %c0_13] : memref<3x1x128xf32, #tpu.memory_space<vmem>>, vector<1x1x128xf32>
    %14 = vector.shape_cast %13 : vector<1x1x128xf32> to vector<1x128xf32>
    %15 = vector.broadcast %14 : vector<1x128xf32> to vector<8x128xf32>
    %16 = arith.addf %12, %15 : vector<8x128xf32>
    %cst_14 = arith.constant 0.000000e+00 : f32
    %17 = vector.broadcast %cst_14 : f32 to vector<8x128xf32>
    %18 = arith.maximumf %16, %17 : vector<8x128xf32>
    %c2 = arith.constant 2 : index
    %c0_15 = arith.constant 0 : index
    %c0_16 = arith.constant 0 : index
    %19 = vector.load %arg2[%c2, %c0_15, %c0_16] : memref<3x128x128xf32, #tpu.memory_space<vmem>>, vector<1x128x128xf32>
    %20 = vector.shape_cast %19 : vector<1x128x128xf32> to vector<128x128xf32>
    %cst_17 = arith.constant dense<0.000000e+00> : vector<8x128xf32>
    %21 = tpu.matmul %18, %20, %cst_17 {dimension_numbers = #tpu.dot_dimension_numbers<[1], [0], [0], [1], [0, 0, 1, 1], [], []>} : vector<8x128xf32>, vector<128x128xf32>, vector<8x128xf32> -> vector<8x128xf32>
    %c2_18 = arith.constant 2 : index
    %c0_19 = arith.constant 0 : index
    %c0_20 = arith.constant 0 : index
    %22 = vector.load %arg3[%c2_18, %c0_19, %c0_20] : memref<3x1x128xf32, #tpu.memory_space<vmem>>, vector<1x1x128xf32>
    %23 = vector.shape_cast %22 : vector<1x1x128xf32> to vector<1x128xf32>
    %24 = vector.broadcast %23 : vector<1x128xf32> to vector<8x128xf32>
    %25 = arith.addf %21, %24 : vector<8x128xf32>
    %c0_21 = arith.constant 0 : index
    %c0_22 = arith.constant 0 : index
    %26 = vector.load %arg4[%c0_21, %c0_22] : memref<8x128xf32, #tpu.memory_space<vmem>>, vector<8x128xf32>
    tpu.vector_store %arg4[%c0_21, %c0_22], %25 {strides = array<i32>} : memref<8x128xf32, #tpu.memory_space<vmem>>, vector<8x128xf32>,
    return
  }
  func.func @transform_0(%arg0: i32) -> (i32, i32) {
    %c0_i32 = arith.constant 0 : i32
    %c0_i32_0 = arith.constant 0 : i32
    return %arg0, %c0_i32 : i32, i32
  }
  func.func @transform_1(%arg0: i32) -> (i32, i32, i32) {
    %c0_i32 = arith.constant 0 : i32
    %c0_i32_0 = arith.constant 0 : i32
    %c0_i32_1 = arith.constant 0 : i32
    %c0_i32_2 = arith.constant 0 : i32
    return %c0_i32, %c0_i32_0, %c0_i32_1 : i32, i32, i32
  }
  func.func @transform_2(%arg0: i32) -> (i32, i32, i32) {
    %c0_i32 = arith.constant 0 : i32
    %c0_i32_0 = arith.constant 0 : i32
    %c0_i32_1 = arith.constant 0 : i32
    %c0_i32_2 = arith.constant 0 : i32
    return %c0_i32, %c0_i32_0, %c0_i32_1 : i32, i32, i32
  }
  func.func @transform_3(%arg0: i32) -> (i32, i32) {
    %c0_i32 = arith.constant 0 : i32
    %c0_i32_0 = arith.constant 0 : i32
    return %arg0, %c0_i32 : i32, i32
  }
}

</mosaic_0001>

<bundles_post_ra>
// kernel: _dqn_forward.1
= control target key start
LH: loop header
LB: loop body
LE: loop exit
PB: predicated region body
PF: predicated region fallthrough
CT: control target
= control target key end

     0   :  { %8 = vsyncpa [#allocation3], 0  ;;  %s197_s15 = smov [#allocation2]   ;;  %s198_s17 = smov 128   ;;  %s238_s0 = inlined_call_operand.vmem [shape: f32[8,128], index: 0, kind: input, shape index: {}]   ;;  %s239_s1 = inlined_call_operand.hbm [shape: f32[3,128,128], index: 1, kind: input, shape index: {}]   ;;  %s240_s2 = inlined_call_operand.vmem [shape: f32[3,1,128], index: 2, kind: input, shape index: {}]   ;;  %s241_s3 = inlined_call_operand.vmem [shape: f32[8,128], index: 3, kind: output, shape index: {}]  }
   0x1   :  { %s15_s14 = sshll.u32 %s239_s1, 4  ;;  %s17_s16 = sshll.u32 %s197_s15, 4  ;;  %s16_s14 = int_to_ptr.hbm [resolvable:$true] %s15_s14  ;;  %s18_s16 = int_to_ptr.vmem [resolvable:$true] %s17_s16 }
   0x2   :  { %s199_s18 = smov 8  }
   0x3   :  { %23 = dma.hbm_to_vmem [thread:$0]  %s16_s14, 6144, %s18_s16, [#allocation3], %s198_s17, %s198_s17, %s199_s18  }
   0x4   :  { %195 = dma.done.wait [#allocation3], 6144  }
   0x5   :  { %196 = vsyncadd [#allocation3], 4294961152  ;;  %v46_v0 = vld [vmem:[#allocation2 + $0x78] sm:$0xff]  ;;  %v45_v1 = vld [vmem:[#allocation2 + $0x70] sm:$0xff] }
   0x6   :  { %51 = vmatpush.msra.mxu0 %v46_v0  ;;  %v44_v2 = vld [vmem:[#allocation2 + $0x68] sm:$0xff]  ;;  %v43_v3 = vld [vmem:[#allocation2 + $0x60] sm:$0xff]  ;;  %v88_v4 = vld [vmem:[#allocation2 + $0xf8] sm:$0xff] }
   0x7   :  { %v42_v5 = vld [vmem:[#allocation2 + $0x58] sm:$0xff]  ;;  %94 = vmatpush.msra.mxu1 %v88_v4  ;;  %v87_v6 = vld [vmem:[#allocation2 + $0xf0] sm:$0xff]  ;;  %v86_v7 = vld [vmem:[#allocation2 + $0xe8] sm:$0xff] }
   0x8   :  { %52 = vmatpush.msra.mxu0 %v45_v1  ;;  %v41_v8 = vld [vmem:[#allocation2 + $0x50] sm:$0xff]  ;;  %v85_v9 = vld [vmem:[#allocation2 + $0xe0] sm:$0xff]  ;;  %v40_v10 = vld [vmem:[#allocation2 + $0x48] sm:$0xff] }
   0x9   :  { %95 = vmatpush.msra.mxu1 %v87_v6  ;;  %v84_v11 = vld [vmem:[#allocation2 + $0xd8] sm:$0xff]  ;;  %v39_v12 = vld [vmem:[#allocation2 + $0x40] sm:$0xff]  ;;  %v83_v13 = vld [vmem:[#allocation2 + $0xd0] sm:$0xff] }
   0xa   :  { %53 = vmatpush.msra.mxu0 %v44_v2  ;;  %v38_v14 = vld [vmem:[#allocation2 + $0x38] sm:$0xff]  ;;  %v82_v15 = vld [vmem:[#allocation2 + $0xc8] sm:$0xff]  ;;  %v37_v16 = vld [vmem:[#allocation2 + $0x30] sm:$0xff] }
   0xb   :  { %96 = vmatpush.msra.mxu1 %v86_v7  ;;  %v81_v17 = vld [vmem:[#allocation2 + $0xc0] sm:$0xff]  ;;  %v36_v18 = vld [vmem:[#allocation2 + $0x28] sm:$0xff]  ;;  %v80_v19 = vld [vmem:[#allocation2 + $0xb8] sm:$0xff] }
   0xc   :  { %54 = vmatpush.msra.mxu0 %v43_v3  ;;  %v35_v20 = vld [vmem:[#allocation2 + $0x20] sm:$0xff]  ;;  %v79_v21 = vld [vmem:[#allocation2 + $0xb0] sm:$0xff]  ;;  %v34_v22 = vld [vmem:[#allocation2 + $0x18] sm:$0xff] }
   0xd   :  { %97 = vmatpush.msra.mxu1 %v85_v9  ;;  %v78_v23 = vld [vmem:[#allocation2 + $0xa8] sm:$0xff]  ;;  %v33_v24 = vld [vmem:[#allocation2 + $0x10] sm:$0xff]  ;;  %v77_v25 = vld [vmem:[#allocation2 + $0xa0] sm:$0xff] }
   0xe   :  { %55 = vmatpush.msra.mxu0 %v42_v5  ;;  %v32_v26 = vld [vmem:[#allocation2 + $0x8] sm:$0xff]  ;;  %v76_v27 = vld [vmem:[#allocation2 + $0x98] sm:$0xff]  ;;  %v31_v28 = vld [vmem:[#allocation2] sm:$0xff] }
   0xf   :  { %98 = vmatpush.msra.mxu1 %v84_v11  ;;  %v30_v29 = vld [vmem:[%s238_s0] sm:$0xff]  ;;  %v75_v30 = vld [vmem:[#allocation2 + $0x90] sm:$0xff]  ;;  %v74_v31 = vld [vmem:[#allocation2 + $0x88] sm:$0xff] }
  0x10   :  { %56 = vmatpush.msra.mxu0 %v41_v8  ;;  %v73_v32 = vld [vmem:[#allocation2 + $0x80] sm:$0xff]  ;;  %v131_v33 = vld [vmem:[#allocation2 + $0x178] sm:$0xff]  ;;  %v130_v34 = vld [vmem:[#allocation2 + $0x170] sm:$0xff] }
  0x11   :  { %99 = vmatpush.msra.mxu1 %v83_v13  ;;  %137 = vmatpush.msra.mxu2 %v131_v33  ;;  %v129_v35 = vld [vmem:[#allocation2 + $0x168] sm:$0xff]  ;;  %v128_v36 = vld [vmem:[#allocation2 + $0x160] sm:$0xff]  ;;  %v127_v37 = vld [vmem:[#allocation2 + $0x158] sm:$0xff] }
  0x12   :  { %57 = vmatpush.msra.mxu0 %v40_v10  ;;  %v126_v38 = vld [vmem:[#allocation2 + $0x150] sm:$0xff]  ;;  %v125_v39 = vld [vmem:[#allocation2 + $0x148] sm:$0xff]  ;;  %v124_v40 = vld [vmem:[#allocation2 + $0x140] sm:$0xff] }
  0x13   :  { %100 = vmatpush.msra.mxu1 %v82_v15  ;;  %138 = vmatpush.msra.mxu2 %v130_v34  ;;  %v123_v41 = vld [vmem:[#allocation2 + $0x138] sm:$0xff]  ;;  %v122_v42 = vld [vmem:[#allocation2 + $0x130] sm:$0xff]  ;;  %v121_v43 = vld [vmem:[#allocation2 + $0x128] sm:$0xff] }
  0x14   :  { %58 = vmatpush.msra.mxu0 %v39_v12  ;;  %v120_v44 = vld [vmem:[#allocation2 + $0x120] sm:$0xff]  ;;  %v119_v45 = vld [vmem:[#allocation2 + $0x118] sm:$0xff]  ;;  %v118_v50 = vld [vmem:[#allocation2 + $0x110] sm:$0xff] }
  0x15   :  { %101 = vmatpush.msra.mxu1 %v81_v17  ;;  %139 = vmatpush.msra.mxu2 %v129_v35  ;;  %v168_v46 = vld [vmem:[%s240_s2] ss:$0 sm:$0xff]  ;;  %v117_v51 = vld [vmem:[#allocation2 + $0x108] sm:$0xff]  ;;  %v169_v53 = vld [vmem:[%s240_s2 + $0x1] ss:$0 sm:$0xff] }
  0x16   :  { %59 = vmatpush.msra.mxu0 %v38_v14  ;;  %v116_v52 = vld [vmem:[#allocation2 + $0x100] sm:$0xff] }
  0x17   :  { %102 = vmatpush.msra.mxu1 %v80_v19  ;;  %140 = vmatpush.msra.mxu2 %v128_v36  ;;  %v170_v57 = vld [vmem:[%s240_s2 + $0x2] ss:$0 sm:$0xff] }
  0x18   :  { %60 = vmatpush.msra.mxu0 %v37_v16 }
  0x19   :  { %103 = vmatpush.msra.mxu1 %v79_v21  ;;  %141 = vmatpush.msra.mxu2 %v127_v37 }
  0x1a   :  { %61 = vmatpush.msra.mxu0 %v36_v18 }
  0x1b   :  { %104 = vmatpush.msra.mxu1 %v78_v23  ;;  %142 = vmatpush.msra.mxu2 %v126_v38 }
  0x1c   :  { %62 = vmatpush.msra.mxu0 %v35_v20 }
  0x1d   :  { %105 = vmatpush.msra.mxu1 %v77_v25  ;;  %143 = vmatpush.msra.mxu2 %v125_v39 }
  0x1e   :  { %63 = vmatpush.msra.mxu0 %v34_v22 }
  0x1f   :  { %106 = vmatpush.msra.mxu1 %v76_v27  ;;  %144 = vmatpush.msra.mxu2 %v124_v40 }
  0x20   :  { %64 = vmatpush.msra.mxu0 %v33_v24 }
  0x21   :  { %107 = vmatpush.msra.mxu1 %v75_v30  ;;  %145 = vmatpush.msra.mxu2 %v123_v41 }
  0x22   :  { %65 = vmatpush.msra.mxu0 %v32_v26 }
  0x23   :  { %108 = vmatpush.msra.mxu1 %v74_v31  ;;  %146 = vmatpush.msra.mxu2 %v122_v42 }
  0x24   :  { %66 = vmatpush.msra.mxu0 %v31_v28 }
  0x25   :  { %67 = vmatmul.f32.vlgmr.msra.gmra.mxu0 %v30_v29  ;;  %109 = vmatpush.msra.mxu1 %v73_v32 }
  0x26   :  { %147 = vmatpush.msra.mxu2 %v121_v43 }
  0x28   :  { %148 = vmatpush.msra.mxu2 %v120_v44 }
  0x2a   :  { %149 = vmatpush.msra.mxu2 %v119_v45 }
  0x2c   :  { %150 = vmatpush.msra.mxu2 %v118_v50 }
  0x2e   :  { %151 = vmatpush.msra.mxu2 %v117_v51 }
  0x30   :  { %152 = vmatpush.msra.mxu2 %v116_v52 }
  0xa2   :  { %v68_v47 = vpop.f32.mrf.mxu0 }
  0xa3   :  { %v69_v48 = vadd.f32 %v168_v46, %v68_v47 }
  0xa5   :  { %v71_v49 = vmax.f32 %v69_v48, 0.0 }
  0xa7   :  { %110 = vmatmul.f32.vlgmr.msra.gmra.mxu1 %v71_v49 }
 0x124   :  { %v111_v54 = vpop.f32.mrf.mxu1 }
 0x125   :  { %v112_v55 = vadd.f32 %v169_v53, %v111_v54 }
 0x127   :  { %v114_v56 = vmax.f32 %v112_v55, 0.0 }
 0x129   :  { %153 = vmatmul.f32.vlgmr.msra.gmra.mxu2 %v114_v56 }
 0x1ac   :  { %v154_v58 = vpop.f32.mrf.mxu2 }
 0x1ad   :  { %v155_v59 = vadd.f32 %v170_v57, %v154_v58 }
 0x1af   :  { %157 = vst [vmem:[%s241_s3] sm:$0xff] %v155_v59 }
 0x1b0   :  { %162 = vsyncpa [#allocation3], 1 }

</bundles_post_ra>
